<compile_context>
chip_gen: v5e
topology: v5e:2x2
jax: 0.10.0
libtpu: 0.0.40
codegen_flags: <defaults>
</compile_context>

<pallas_src>
import functools

import jax
import jax.numpy as jnp
from jax.experimental import pallas as pl
from jax.experimental.pallas import tpu as pltpu


def block_kernel(x_ref,
                 w12_ref, b12_ref,
                 w34_ref, b34_ref,
                 o_ref,
                 h_ref,
                 *, compute_dtype):
    # Cast x in-kernel (x arrives as f32 — avoids a wrapper-side HBM pass).
    x = x_ref[...].astype(compute_dtype)

    # Fused layer 1+2: one MXU dot, bias folded into the ReLU expression.
    h = jnp.dot(x, w12_ref[...], preferred_element_type=jnp.float32)
    # Inter-layer activation parked explicitly in VMEM scratch (too big for vregs
    # at fat tiles), already in the compute dtype for the next dot.
    h_ref[...] = jnp.maximum(h + b12_ref[...], 0.0).astype(compute_dtype)

    # Fused layer 3+4.
    h2 = jnp.dot(h_ref[...], w34_ref[...], preferred_element_type=jnp.float32)
    o_ref[...] = jnp.maximum(h2 + b34_ref[...], 0.0).astype(o_ref.dtype)


def _choose_tile_m(bs, d, x_bytes, out_bytes, w_bytes, cap=1024):
    """Pick the row-tile.

    Single fat tile by default (the grid is a serial loop on 1-TC chips, so
    extra steps only add ~0.35us each).  Split below the cap (useful only for
    v7x's 2 TensorCores) solely when per-TC activation traffic clearly
    dominates the fused-weight traffic that would be duplicated per TC.
    """
    tile = min(bs, cap)
    if bs <= cap:
        half = (bs // 2) // 8 * 8          # keep (8,128) block constraint
        if half >= 128:
            act_per_tc = half * d * (x_bytes + out_bytes)
            fused_w = 2 * d * d * w_bytes  # both fused weights, per TC copy
            if act_per_tc > 4 * fused_w:   # margin: only split when clearly worth it
                tile = half
    return max(int(tile), 1)


def block_forward(x, params, *, tile_m=None, use_bf16=True, out_dtype=None):
    """x: [batch, d_model] f32.
    params: dict with w{1..4} ([d, d], stored as W^T) and b{1..4} ([1, d])."""
    bs, d = x.shape
    compute_dtype = jnp.bfloat16 if use_bf16 else x.dtype
    out_dtype = x.dtype if out_dtype is None else out_dtype

    # --- Host-side algebraic fusion of the two Linear pairs (exact in f32). ---
    # For the bf16 path the fused product is computed in f32 and cast once,
    # which is no less accurate than two sequential bf16 matmuls.
    w1, w2, w3, w4 = (params[f"w{i}"].astype(jnp.float32) for i in (1, 2, 3, 4))
    b1, b2, b3, b4 = (params[f"b{i}"].astype(jnp.float32) for i in (1, 2, 3, 4))
    w12 = (w1 @ w2).astype(compute_dtype)
    b12 = (b1 @ w2 + b2).astype(jnp.float32)
    w34 = (w3 @ w4).astype(compute_dtype)
    b34 = (b3 @ w4 + b4).astype(jnp.float32)

    x_bytes = x.dtype.itemsize
    o_bytes = jnp.dtype(out_dtype).itemsize
    w_bytes = jnp.dtype(compute_dtype).itemsize

    if tile_m is None:
        tile_m = _choose_tile_m(bs, d, x_bytes, o_bytes, w_bytes)
    tile_m = min(tile_m, bs)
    grid_m = pl.cdiv(bs, tile_m)  # partial last block handles ragged batches

    x_spec = pl.BlockSpec((tile_m, d), lambda i: (i, 0))
    o_spec = pl.BlockSpec((tile_m, d), lambda i: (i, 0))
    # Grid-invariant operands: single-buffered (double-buffering would hold two
    # copies of each fused d x d weight in VMEM for zero benefit).
    w_spec = pl.BlockSpec((d, d), lambda i: (0, 0), pipeline_mode=pl.Buffered(1))
    b_spec = pl.BlockSpec((1, d), lambda i: (0, 0), pipeline_mode=pl.Buffered(1))

    # VMEM budget: fused weights (single-buffered) + double-buffered x / out
    # tiles + h scratch + f32 dot results, with headroom.  Keep well below the
    # physical limit on every generation (v7x: 64 MiB/TC).
    vmem_est = (
        2 * d * d * w_bytes                # w12, w34
        + 2 * 8 * d * 4                    # biases (sublane-padded)
        + 2 * tile_m * d * x_bytes         # x tile, double-buffered
        + 2 * tile_m * d * o_bytes         # out tile, double-buffered
        + tile_m * d * w_bytes             # h scratch (compute dtype)
        + 2 * tile_m * d * 4               # f32 dot results live range
    )
    vmem_limit = int(min(max(2 * vmem_est, 32 * 1024 * 1024), 96 * 1024 * 1024))

    flops = 4 * grid_m * tile_m * d * d    # 2 fused layers x (2*M*K*N)
    bytes_accessed = int(
        bs * d * x_bytes
        + 2 * d * d * w_bytes
        + 2 * d * 4
        + bs * d * o_bytes
    )

    kernel = functools.partial(block_kernel, compute_dtype=compute_dtype)

    out = pl.pallas_call(
        kernel,
        out_shape=jax.ShapeDtypeStruct((bs, d), out_dtype),
        grid_spec=pltpu.PrefetchScalarGridSpec(
            num_scalar_prefetch=0,
            grid=(grid_m,),
            in_specs=[x_spec,
                      w_spec, b_spec,
                      w_spec, b_spec],
            out_specs=o_spec,
            scratch_shapes=[pltpu.VMEM((tile_m, d), compute_dtype)],
        ),
        compiler_params=pltpu.CompilerParams(
            dimension_semantics=("parallel",),
            vmem_limit_bytes=vmem_limit),
        cost_estimate=pl.CostEstimate(
            flops=int(flops), transcendentals=0, bytes_accessed=bytes_accessed),
    )(x, w12, b12, w34, b34)

    return out


def reference_forward(x, params):
    # Unfused 4-linear reference (ground truth for the PyTorch module).
    h = x @ params["w1"] + params["b1"]
    h = h @ params["w2"] + params["b2"]
    h = jnp.maximum(h, 0.0)
    h = h @ params["w3"] + params["b3"]
    h = h @ params["w4"] + params["b4"]
    h = jnp.maximum(h, 0.0)
    return h


def init_params(key, d_model):
    # Deterministic init mimicking torch.nn.Linear's uniform(-1/sqrt(d), 1/sqrt(d)).
    bound = 1.0 / jnp.sqrt(jnp.float32(d_model))
    keys = jax.random.split(key, 8)
    params = {}
    for li in range(4):
        w = jax.random.uniform(keys[2 * li], (d_model, d_model),
                               minval=-bound, maxval=bound, dtype=jnp.float32)
        b = jax.random.uniform(keys[2 * li + 1], (1, d_model),
                               minval=-bound, maxval=bound, dtype=jnp.float32)
        # Store W^T so the math is x @ Wt (PyTorch Linear does x @ W.T).
        params[f"w{li + 1}"] = w.T
        params[f"b{li + 1}"] = b
    return params


if __name__ == "__main__":
    # Small shapes consistent with the module: rows of d_model features.
    bs, d_model = 256, 128
    key = jax.random.PRNGKey(0)
    k_x, k_p = jax.random.split(key)

    x = jax.random.normal(k_x, (bs, d_model), dtype=jnp.float32)
    params = init_params(k_p, d_model)
    ref = reference_forward(x, params)

    # 1) f32-operand path (fused weights in f32; tiny reassociation difference only).
    out_f32 = jax.block_until_ready(block_forward(x, params, use_bf16=False))
    assert out_f32.shape == (bs, d_model)
    assert jnp.allclose(out_f32, ref, atol=5e-4, rtol=5e-4), "f32 path mismatch"

    # 2) bf16-operand / f32-accumulation path (default).
    out_bf16 = jax.block_until_ready(block_forward(x, params, use_bf16=True))
    assert jnp.allclose(out_bf16, ref, atol=7e-2, rtol=7e-2), "bf16 path mismatch"

    # 3) Ragged batch + forced multi-step grid: exercises the cdiv grid's
    #    partial last block (no wrapper-side padding).
    bs_r = 200
    x_r = jax.random.normal(jax.random.PRNGKey(1), (bs_r, d_model), dtype=jnp.float32)
    ref_r = reference_forward(x_r, params)
    out_r = jax.block_until_ready(
        block_forward(x_r, params, use_bf16=False, tile_m=128))
    assert out_r.shape == (bs_r, d_model)
    assert jnp.allclose(out_r, ref_r, atol=5e-4, rtol=5e-4), "ragged path mismatch"

    print("KERNEL_OK")
</pallas_src>

<mosaic_0001>
module attributes {stable_mosaic.version = 11 : i64} {
  func.func @block_kernel(%arg0: i32, %arg1: memref<256x128xf32, #tpu.memory_space<vmem>>, %arg2: memref<128x128xf32, #tpu.memory_space<vmem>>, %arg3: memref<1x128xf32, #tpu.memory_space<vmem>>, %arg4: memref<128x128xf32, #tpu.memory_space<vmem>>, %arg5: memref<1x128xf32, #tpu.memory_space<vmem>>, %arg6: memref<256x128xf32, #tpu.memory_space<vmem>>, %arg7: memref<256x128xf32, #tpu.memory_space<vmem>>) attributes {dimension_semantics = [#tpu.dimension_semantics<parallel>], iteration_bounds = array<i64: 1>, scalar_prefetch = 0 : i64, scratch_operands = 1 : i64, tpu.core_type = #tpu.core_type<tc>, window_params = [{transform_indices = @transform_0, window_bounds = array<i64: 256, 128>}, {pipeline_mode = #tpu.pipeline_mode<synchronous>, transform_indices = @transform_1, window_bounds = array<i64: 128, 128>}, {pipeline_mode = #tpu.pipeline_mode<synchronous>, transform_indices = @transform_2, window_bounds = array<i64: 1, 128>}, {pipeline_mode = #tpu.pipeline_mode<synchronous>, transform_indices = @transform_3, window_bounds = array<i64: 128, 128>}, {pipeline_mode = #tpu.pipeline_mode<synchronous>, transform_indices = @transform_4, window_bounds = array<i64: 1, 128>}, {transform_indices = @transform_5, window_bounds = array<i64: 256, 128>}]} {
    %c0 = arith.constant 0 : index
    %c0_0 = arith.constant 0 : index
    %0 = vector.load %arg1[%c0, %c0_0] : memref<256x128xf32, #tpu.memory_space<vmem>>, vector<256x128xf32>
    %c0_1 = arith.constant 0 : index
    %c0_2 = arith.constant 0 : index
    %1 = vector.load %arg2[%c0_1, %c0_2] : memref<128x128xf32, #tpu.memory_space<vmem>>, vector<128x128xf32>
    %cst = arith.constant dense<0.000000e+00> : vector<256x128xf32>
    %2 = tpu.matmul %0, %1, %cst {dimension_numbers = #tpu.dot_dimension_numbers<[1], [0], [0], [1], [0, 0, 1, 1], [], []>} : vector<256x128xf32>, vector<128x128xf32>, vector<256x128xf32> -> vector<256x128xf32>
    %c0_3 = arith.constant 0 : index
    %c0_4 = arith.constant 0 : index
    %3 = vector.load %arg3[%c0_3, %c0_4] : memref<1x128xf32, #tpu.memory_space<vmem>>, vector<1x128xf32>
    %4 = vector.broadcast %3 : vector<1x128xf32> to vector<256x128xf32>
    %5 = arith.addf %2, %4 : vector<256x128xf32>
    %cst_5 = arith.constant 0.000000e+00 : f32
    %6 = vector.broadcast %cst_5 : f32 to vector<256x128xf32>
    %7 = arith.maximumf %5, %6 : vector<256x128xf32>
    %c0_6 = arith.constant 0 : index
    %c0_7 = arith.constant 0 : index
    %8 = vector.load %arg7[%c0_6, %c0_7] : memref<256x128xf32, #tpu.memory_space<vmem>>, vector<256x128xf32>
    tpu.vector_store %arg7[%c0_6, %c0_7], %7 {strides = array<i32>} : memref<256x128xf32, #tpu.memory_space<vmem>>, vector<256x128xf32>,
    %c0_8 = arith.constant 0 : index
    %c0_9 = arith.constant 0 : index
    %9 = vector.load %arg7[%c0_8, %c0_9] : memref<256x128xf32, #tpu.memory_space<vmem>>, vector<256x128xf32>
    %c0_10 = arith.constant 0 : index
    %c0_11 = arith.constant 0 : index
    %10 = vector.load %arg4[%c0_10, %c0_11] : memref<128x128xf32, #tpu.memory_space<vmem>>, vector<128x128xf32>
    %cst_12 = arith.constant dense<0.000000e+00> : vector<256x128xf32>
    %11 = tpu.matmul %9, %10, %cst_12 {dimension_numbers = #tpu.dot_dimension_numbers<[1], [0], [0], [1], [0, 0, 1, 1], [], []>} : vector<256x128xf32>, vector<128x128xf32>, vector<256x128xf32> -> vector<256x128xf32>
    %c0_13 = arith.constant 0 : index
    %c0_14 = arith.constant 0 : index
    %12 = vector.load %arg5[%c0_13, %c0_14] : memref<1x128xf32, #tpu.memory_space<vmem>>, vector<1x128xf32>
    %13 = vector.broadcast %12 : vector<1x128xf32> to vector<256x128xf32>
    %14 = arith.addf %11, %13 : vector<256x128xf32>
    %cst_15 = arith.constant 0.000000e+00 : f32
    %15 = vector.broadcast %cst_15 : f32 to vector<256x128xf32>
    %16 = arith.maximumf %14, %15 : vector<256x128xf32>
    %c0_16 = arith.constant 0 : index
    %c0_17 = arith.constant 0 : index
    %17 = vector.load %arg6[%c0_16, %c0_17] : memref<256x128xf32, #tpu.memory_space<vmem>>, vector<256x128xf32>
    tpu.vector_store %arg6[%c0_16, %c0_17], %16 {strides = array<i32>} : memref<256x128xf32, #tpu.memory_space<vmem>>, vector<256x128xf32>,
    return
  }
  func.func @transform_0(%arg0: i32) -> (i32, i32) {
    %c0_i32 = arith.constant 0 : i32
    %c0_i32_0 = arith.constant 0 : i32
    return %arg0, %c0_i32 : i32, i32
  }
  func.func @transform_1(%arg0: i32) -> (i32, i32) {
    %c0_i32 = arith.constant 0 : i32
    %c0_i32_0 = arith.constant 0 : i32
    %c0_i32_1 = arith.constant 0 : i32
    return %c0_i32, %c0_i32_0 : i32, i32
  }
  func.func @transform_2(%arg0: i32) -> (i32, i32) {
    %c0_i32 = arith.constant 0 : i32
    %c0_i32_0 = arith.constant 0 : i32
    %c0_i32_1 = arith.constant 0 : i32
    return %c0_i32, %c0_i32_0 : i32, i32
  }
  func.func @transform_3(%arg0: i32) -> (i32, i32) {
    %c0_i32 = arith.constant 0 : i32
    %c0_i32_0 = arith.constant 0 : i32
    %c0_i32_1 = arith.constant 0 : i32
    return %c0_i32, %c0_i32_0 : i32, i32
  }
  func.func @transform_4(%arg0: i32) -> (i32, i32) {
    %c0_i32 = arith.constant 0 : i32
    %c0_i32_0 = arith.constant 0 : i32
    %c0_i32_1 = arith.constant 0 : i32
    return %c0_i32, %c0_i32_0 : i32, i32
  }
  func.func @transform_5(%arg0: i32) -> (i32, i32) {
    %c0_i32 = arith.constant 0 : i32
    %c0_i32_0 = arith.constant 0 : i32
    return %arg0, %c0_i32 : i32, i32
  }
}

</mosaic_0001>

<bundles_post_ra>
// kernel: tpu_custom_call.1
= control target key start
LH: loop header
LB: loop body
LE: loop exit
PB: predicated region body
PF: predicated region fallthrough
CT: control target
= control target key end

     0   :  { %10 = vsyncpa [#allocation4], 0  ;;  %s822_s0 = inlined_call_operand.hbm [shape: f32[256,128], index: 0, kind: input, shape index: {}]   ;;  %s823_s1 = inlined_call_operand.hbm [shape: f32[128,128], index: 1, kind: input, shape index: {}]   ;;  %s824_s2 = inlined_call_operand.vmem [shape: f32[1,128], index: 2, kind: input, shape index: {}]   ;;  %s825_s3 = inlined_call_operand.hbm [shape: f32[128,128], index: 3, kind: input, shape index: {}]   ;;  %s826_s4 = inlined_call_operand.vmem [shape: f32[1,128], index: 4, kind: input, shape index: {}]   ;;  %s827_s5 = inlined_call_operand.hbm [shape: f32[256,128], index: 5, kind: output, shape index: {}]  }
   0x1   :  { %11 = vsyncpa [#allocation7], 0 }
   0x2   :  { %12 = vsyncpa [#allocation5], 0  ;;  %s30_s20 = sshll.u32 %s823_s1, 4  ;;  %s688_s21 = smov [#allocation6]   ;;  %s31_s20 = int_to_ptr.hbm [resolvable:$true] %s30_s20 }
   0x3   :  { %s32_s22 = sshll.u32 %s688_s21, 4  ;;  %s17_s25 = sshll.u32 %s822_s0, 4  ;;  %s33_s22 = int_to_ptr.vmem [resolvable:$true] %s32_s22  ;;  %s18_s25 = int_to_ptr.hbm [resolvable:$true] %s17_s25 }
   0x4   :  { %s689_s26 = smov 128   ;;  %s690_s27 = smov 8  }
   0x5   :  { %38 = dma.hbm_to_vmem [thread:$0]  %s31_s20, 2048, %s33_s22, [#allocation7], %s689_s26, %s689_s26, %s690_s27  }
   0x6   :  { %s691_s28 = smov [#allocation3]   ;;  %s45_s1 = sshll.u32 %s825_s3, 4  ;;  %s46_s1 = int_to_ptr.hbm [resolvable:$true] %s45_s1 }
   0x7   :  { %s19_s29 = sshll.u32 %s691_s28, 4  ;;  %s692_s0 = smov [#allocation8]   ;;  %s20_s29 = int_to_ptr.vmem [resolvable:$true] %s19_s29 }
   0x8   :  { %25 = dma.hbm_to_vmem [thread:$0]  %s18_s25, 4096, %s20_s29, [#allocation4], %s689_s26, %s689_s26, %s690_s27  }
   0x9   :  { %s47_s7 = sshll.u32 %s692_s0, 4  ;;  %s48_s7 = int_to_ptr.vmem [resolvable:$true] %s47_s7 }
   0xa   :  { %53 = dma.hbm_to_vmem [thread:$0]  %s46_s1, 2048, %s48_s7, [#allocation7], %s689_s26, %s689_s26, %s690_s27  }
   0xb   :  { %682 = dma.done.wait [#allocation4], 4096  }
   0xc   :  { %683 = vsyncadd [#allocation4], 4294963200 }
   0xd   :  { %684 = dma.done.wait [#allocation7], 4096  }
   0xe   :  { %685 = vsyncadd [#allocation7], 4294963200  ;;  %v115_v0 = vld [vmem:[#allocation6 + $0x78] sm:$0xff]  ;;  %v114_v1 = vld [vmem:[#allocation6 + $0x70] sm:$0xff]  ;;  %s532_s13 = sshll.u32 %s827_s5, 4  ;;  %s533_s13 = int_to_ptr.hbm [resolvable:$true] %s532_s13 }
   0xf   :  { %546 = vmatpush.msra.mxu2 %v115_v0  ;;  %120 = vmatpush.msra.mxu0 %v115_v0  ;;  %v113_v2 = vld [vmem:[#allocation6 + $0x68] sm:$0xff]  ;;  %v112_v3 = vld [vmem:[#allocation6 + $0x60] sm:$0xff]  ;;  %v111_v4 = vld [vmem:[#allocation6 + $0x58] sm:$0xff] }
  0x10   :  { %v110_v5 = vld [vmem:[#allocation6 + $0x50] sm:$0xff]  ;;  %v109_v6 = vld [vmem:[#allocation6 + $0x48] sm:$0xff]  ;;  %v108_v7 = vld [vmem:[#allocation6 + $0x40] sm:$0xff] }
  0x11   :  { %547 = vmatpush.msra.mxu2 %v114_v1  ;;  %121 = vmatpush.msra.mxu0 %v114_v1  ;;  %v107_v8 = vld [vmem:[#allocation6 + $0x38] sm:$0xff]  ;;  %v106_v9 = vld [vmem:[#allocation6 + $0x30] sm:$0xff]  ;;  %v105_v10 = vld [vmem:[#allocation6 + $0x28] sm:$0xff] }
  0x12   :  { %v104_v11 = vld [vmem:[#allocation6 + $0x20] sm:$0xff]  ;;  %v103_v12 = vld [vmem:[#allocation6 + $0x18] sm:$0xff]  ;;  %v102_v13 = vld [vmem:[#allocation6 + $0x10] sm:$0xff] }
  0x13   :  { %548 = vmatpush.msra.mxu2 %v113_v2  ;;  %122 = vmatpush.msra.mxu0 %v113_v2  ;;  %v101_v14 = vld [vmem:[#allocation6 + $0x8] sm:$0xff]  ;;  %v100_v15 = vld [vmem:[#allocation6] sm:$0xff]  ;;  %v86_v20 = vld [vmem:[#allocation3 + $0x90] sm:$0xff] }
  0x14   :  { %v84_v16 = vld [vmem:[#allocation3 + $0x80] sm:$0xff]  ;;  %v85_v18 = vld [vmem:[#allocation3 + $0x88] sm:$0xff]  ;;  %v70_v21 = vld [vmem:[#allocation3 + $0x10] sm:$0xff] }
  0x15   :  { %549 = vmatpush.msra.mxu2 %v112_v3  ;;  %123 = vmatpush.msra.mxu0 %v112_v3  ;;  %v68_v17 = vld [vmem:[#allocation3] sm:$0xff]  ;;  %v69_v19 = vld [vmem:[#allocation3 + $0x8] sm:$0xff]  ;;  %v87_v22 = vld [vmem:[#allocation3 + $0x98] sm:$0xff] }
  0x16   :  { %v71_v23 = vld [vmem:[#allocation3 + $0x18] sm:$0xff]  ;;  %v88_v24 = vld [vmem:[#allocation3 + $0xa0] sm:$0xff]  ;;  %v89_v26 = vld [vmem:[#allocation3 + $0xa8] sm:$0xff] }
  0x17   :  { %550 = vmatpush.msra.mxu2 %v111_v4  ;;  %124 = vmatpush.msra.mxu0 %v111_v4  ;;  %v72_v25 = vld [vmem:[#allocation3 + $0x20] sm:$0xff]  ;;  %v73_v27 = vld [vmem:[#allocation3 + $0x28] sm:$0xff]  ;;  %v90_v28 = vld [vmem:[#allocation3 + $0xb0] sm:$0xff] }
  0x18   :  { %v74_v29 = vld [vmem:[#allocation3 + $0x30] sm:$0xff]  ;;  %v91_v30 = vld [vmem:[#allocation3 + $0xb8] sm:$0xff]  ;;  %v92_v32 = vld [vmem:[#allocation3 + $0xc0] sm:$0xff] }
  0x19   :  { %551 = vmatpush.msra.mxu2 %v110_v5  ;;  %125 = vmatpush.msra.mxu0 %v110_v5  ;;  %v75_v31 = vld [vmem:[#allocation3 + $0x38] sm:$0xff]  ;;  %v76_v33 = vld [vmem:[#allocation3 + $0x40] sm:$0xff]  ;;  %v93_v34 = vld [vmem:[#allocation3 + $0xc8] sm:$0xff] }
  0x1a   :  { %v77_v35 = vld [vmem:[#allocation3 + $0x48] sm:$0xff]  ;;  %v344_v36 = vld [vmem:[#allocation8 + $0x78] sm:$0xff]  ;;  %v343_v37 = vld [vmem:[#allocation8 + $0x70] sm:$0xff] }
  0x1b   :  { %552 = vmatpush.msra.mxu2 %v109_v6  ;;  %126 = vmatpush.msra.mxu0 %v109_v6  ;;  %v342_v38 = vld [vmem:[#allocation8 + $0x68] sm:$0xff]  ;;  %v341_v39 = vld [vmem:[#allocation8 + $0x60] sm:$0xff]  ;;  %v94_v40 = vld [vmem:[#allocation3 + $0xd0] sm:$0xff] }
  0x1c   :  { %562 = vmatpush.msra.mxu3 %v344_v36  ;;  %349 = vmatpush.msra.mxu1 %v344_v36  ;;  %v78_v41 = vld [vmem:[#allocation3 + $0x50] sm:$0xff]  ;;  %v340_v42 = vld [vmem:[#allocation8 + $0x58] sm:$0xff]  ;;  %v338_v44 = vld [vmem:[#allocation8 + $0x48] sm:$0xff] }
  0x1d   :  { %553 = vmatpush.msra.mxu2 %v108_v7  ;;  %127 = vmatpush.msra.mxu0 %v108_v7  ;;  %v339_v43 = vld [vmem:[#allocation8 + $0x50] sm:$0xff]  ;;  %v337_v45 = vld [vmem:[#allocation8 + $0x40] sm:$0xff]  ;;  %v95_v46 = vld [vmem:[#allocation3 + $0xd8] sm:$0xff] }
  0x1e   :  { %563 = vmatpush.msra.mxu3 %v343_v37  ;;  %350 = vmatpush.msra.mxu1 %v343_v37  ;;  %v79_v47 = vld [vmem:[#allocation3 + $0x58] sm:$0xff]  ;;  %v335_v49 = vld [vmem:[#allocation8 + $0x30] sm:$0xff]  ;;  %v334_v50 = vld [vmem:[#allocation8 + $0x28] sm:$0xff] }
  0x1f   :  { %554 = vmatpush.msra.mxu2 %v107_v8  ;;  %128 = vmatpush.msra.mxu0 %v107_v8  ;;  %v336_v48 = vld [vmem:[#allocation8 + $0x38] sm:$0xff]  ;;  %v333_v51 = vld [vmem:[#allocation8 + $0x20] sm:$0xff]  ;;  %v331_v55 = vld [vmem:[#allocation8 + $0x10] sm:$0xff] }
  0x20   :  { %564 = vmatpush.msra.mxu3 %v342_v38  ;;  %351 = vmatpush.msra.mxu1 %v342_v38  ;;  %v96_v52 = vld [vmem:[#allocation3 + $0xe0] sm:$0xff]  ;;  %v332_v54 = vld [vmem:[#allocation8 + $0x18] sm:$0xff]  ;;  %v330_v56 = vld [vmem:[#allocation8 + $0x8] sm:$0xff] }
  0x21   :  { %555 = vmatpush.msra.mxu2 %v106_v9  ;;  %129 = vmatpush.msra.mxu0 %v106_v9  ;;  %v80_v53 = vld [vmem:[#allocation3 + $0x60] sm:$0xff]  ;;  %v97_v57 = vld [vmem:[#allocation3 + $0xe8] sm:$0xff]  ;;  %v98_v60 = vld [vmem:[#allocation3 + $0xf0] sm:$0xff] }
  0x22   :  { %565 = vmatpush.msra.mxu3 %v341_v39  ;;  %352 = vmatpush.msra.mxu1 %v341_v39  ;;  %v81_v58 = vld [vmem:[#allocation3 + $0x68] sm:$0xff]  ;;  %v329_v59 = vld [vmem:[#allocation8] sm:$0xff]  ;;  %v82_v61 = vld [vmem:[#allocation3 + $0x70] sm:$0xff] }
  0x23   :  { %556 = vmatpush.msra.mxu2 %v105_v10  ;;  %130 = vmatpush.msra.mxu0 %v105_v10  ;;  %v99_v62 = vld [vmem:[#allocation3 + $0xf8] sm:$0xff]  ;;  %v745_v0 = vld [vmem:[%s824_s2] ss:$0 sm:$0xff] }
  0x24   :  { %566 = vmatpush.msra.mxu3 %v340_v42  ;;  %353 = vmatpush.msra.mxu1 %v340_v42  ;;  %v83_v63 = vld [vmem:[#allocation3 + $0x78] sm:$0xff] }
  0x25   :  { %557 = vmatpush.msra.mxu2 %v104_v11  ;;  %131 = vmatpush.msra.mxu0 %v104_v11 }
  0x26   :  { %567 = vmatpush.msra.mxu3 %v339_v43  ;;  %354 = vmatpush.msra.mxu1 %v339_v43 }
  0x27   :  { %558 = vmatpush.msra.mxu2 %v103_v12  ;;  %132 = vmatpush.msra.mxu0 %v103_v12 }
  0x28   :  { %568 = vmatpush.msra.mxu3 %v338_v44  ;;  %355 = vmatpush.msra.mxu1 %v338_v44 }
  0x29   :  { %559 = vmatpush.msra.mxu2 %v102_v13  ;;  %133 = vmatpush.msra.mxu0 %v102_v13 }
  0x2a   :  { %569 = vmatpush.msra.mxu3 %v337_v45  ;;  %356 = vmatpush.msra.mxu1 %v337_v45 }
  0x2b   :  { %560 = vmatpush.msra.mxu2 %v101_v14  ;;  %134 = vmatpush.msra.mxu0 %v101_v14 }
  0x2c   :  { %570 = vmatpush.msra.mxu3 %v336_v48  ;;  %357 = vmatpush.msra.mxu1 %v336_v48 }
  0x2d   :  { %561 = vmatpush.msra.mxu2 %v100_v15  ;;  %135 = vmatpush.msra.mxu0 %v100_v15 }
  0x2e   :  { %184 = vmatmul.f32.vlgmr.msra.gmra.mxu2 %v84_v16  ;;  %136 = vmatmul.f32.vlgmr.msra.gmra.mxu0 %v68_v17 }
  0x2f   :  { %571 = vmatpush.msra.mxu3 %v335_v49  ;;  %358 = vmatpush.msra.mxu1 %v335_v49 }
  0x31   :  { %572 = vmatpush.msra.mxu3 %v334_v50  ;;  %359 = vmatpush.msra.mxu1 %v334_v50 }
  0x33   :  { %573 = vmatpush.msra.mxu3 %v333_v51  ;;  %360 = vmatpush.msra.mxu1 %v333_v51 }
  0x35   :  { %574 = vmatpush.msra.mxu3 %v332_v54  ;;  %361 = vmatpush.msra.mxu1 %v332_v54 }
  0x36   :  { %187 = vmatmul.f32.gmra.mxu2 %v85_v18  ;;  %139 = vmatmul.f32.gmra.mxu0 %v69_v19 }
  0x37   :  { %575 = vmatpush.msra.mxu3 %v331_v55  ;;  %362 = vmatpush.msra.mxu1 %v331_v55 }
  0x39   :  { %576 = vmatpush.msra.mxu3 %v330_v56  ;;  %363 = vmatpush.msra.mxu1 %v330_v56 }
  0x3b   :  { %577 = vmatpush.msra.mxu3 %v329_v59  ;;  %364 = vmatpush.msra.mxu1 %v329_v59 }
  0x3e   :  { %190 = vmatmul.f32.gmra.mxu2 %v86_v20  ;;  %142 = vmatmul.f32.gmra.mxu0 %v70_v21 }
  0x46   :  { %193 = vmatmul.f32.gmra.mxu2 %v87_v22  ;;  %145 = vmatmul.f32.gmra.mxu0 %v71_v23 }
  0x4e   :  { %196 = vmatmul.f32.gmra.mxu2 %v88_v24  ;;  %148 = vmatmul.f32.gmra.mxu0 %v72_v25 }
  0x56   :  { %199 = vmatmul.f32.gmra.mxu2 %v89_v26  ;;  %151 = vmatmul.f32.gmra.mxu0 %v73_v27 }
  0x5e   :  { %202 = vmatmul.f32.gmra.mxu2 %v90_v28  ;;  %154 = vmatmul.f32.gmra.mxu0 %v74_v29 }
  0x66   :  { %205 = vmatmul.f32.gmra.mxu2 %v91_v30  ;;  %157 = vmatmul.f32.gmra.mxu0 %v75_v31 }
  0x6e   :  { %208 = vmatmul.f32.gmra.mxu2 %v92_v32  ;;  %160 = vmatmul.f32.gmra.mxu0 %v76_v33 }
  0x76   :  { %211 = vmatmul.f32.gmra.mxu2 %v93_v34  ;;  %163 = vmatmul.f32.gmra.mxu0 %v77_v35 }
  0x7e   :  { %214 = vmatmul.f32.gmra.mxu2 %v94_v40  ;;  %166 = vmatmul.f32.gmra.mxu0 %v78_v41 }
  0x86   :  { %217 = vmatmul.f32.gmra.mxu2 %v95_v46  ;;  %169 = vmatmul.f32.gmra.mxu0 %v79_v47 }
  0x8e   :  { %220 = vmatmul.f32.gmra.mxu2 %v96_v52  ;;  %172 = vmatmul.f32.gmra.mxu0 %v80_v53 }
  0x96   :  { %223 = vmatmul.f32.gmra.mxu2 %v97_v57  ;;  %175 = vmatmul.f32.gmra.mxu0 %v81_v58 }
  0x9e   :  { %226 = vmatmul.f32.gmra.mxu2 %v98_v60  ;;  %178 = vmatmul.f32.gmra.mxu0 %v82_v61 }
  0xa6   :  { %229 = vmatmul.f32.gmra.mxu2 %v99_v62  ;;  %181 = vmatmul.f32.gmra.mxu0 %v83_v63 }
  0xab   :  { %v137_v1 = vpop.f32.mrf.mxu0 }
  0xac   :  { %v138_v2 = vadd.f32 %v745_v0, %v137_v1 }
  0xae   :  { %v233_v3 = vmax.f32 %v138_v2, 0.0 }
  0xb0   :  { %365 = vmatmul.f32.vlgmr.msra.gmra.mxu1 %v233_v3 }
  0xb1   :  { %v185_v4 = vpop.f32.mrf.mxu2 }
  0xb2   :  { %v186_v5 = vadd.f32 %v745_v0, %v185_v4 }
  0xb3   :  { %v140_v6 = vpop.f32.mrf.mxu0 }
  0xb4   :  { %v249_v7 = vmax.f32 %v186_v5, 0.0  ;;  %v141_v8 = vadd.f32 %v745_v0, %v140_v6 }
  0xb6   :  { %413 = vmatmul.f32.vlgmr.msra.gmra.mxu3 %v249_v7  ;;  %v234_v9 = vmax.f32 %v141_v8, 0.0 }
  0xb8   :  { %368 = vmatmul.f32.gmra.mxu1 %v234_v9 }
  0xb9   :  { %v188_v10 = vpop.f32.mrf.mxu2 }
  0xba   :  { %v189_v11 = vadd.f32 %v745_v0, %v188_v10 }
  0xbb   :  { %v143_v12 = vpop.f32.mrf.mxu0 }
  0xbc   :  { %v250_v13 = vmax.f32 %v189_v11, 0.0  ;;  %v144_v14 = vadd.f32 %v745_v0, %v143_v12 }
  0xbe   :  { %416 = vmatmul.f32.gmra.mxu3 %v250_v13  ;;  %v235_v15 = vmax.f32 %v144_v14, 0.0 }
  0xc0   :  { %371 = vmatmul.f32.gmra.mxu1 %v235_v15 }
  0xc1   :  { %v191_v16 = vpop.f32.mrf.mxu2 }
  0xc2   :  { %v192_v17 = vadd.f32 %v745_v0, %v191_v16 }
  0xc3   :  { %v146_v18 = vpop.f32.mrf.mxu0 }
  0xc4   :  { %v251_v19 = vmax.f32 %v192_v17, 0.0  ;;  %v147_v20 = vadd.f32 %v745_v0, %v146_v18 }
  0xc6   :  { %419 = vmatmul.f32.gmra.mxu3 %v251_v19  ;;  %v236_v21 = vmax.f32 %v147_v20, 0.0 }
  0xc8   :  { %374 = vmatmul.f32.gmra.mxu1 %v236_v21 }
  0xc9   :  { %v194_v22 = vpop.f32.mrf.mxu2 }
  0xca   :  { %v195_v23 = vadd.f32 %v745_v0, %v194_v22 }
  0xcb   :  { %v149_v24 = vpop.f32.mrf.mxu0 }
  0xcc   :  { %v252_v25 = vmax.f32 %v195_v23, 0.0  ;;  %v150_v26 = vadd.f32 %v745_v0, %v149_v24 }
  0xce   :  { %422 = vmatmul.f32.gmra.mxu3 %v252_v25  ;;  %v237_v27 = vmax.f32 %v150_v26, 0.0 }
  0xd0   :  { %377 = vmatmul.f32.gmra.mxu1 %v237_v27 }
  0xd1   :  { %v197_v28 = vpop.f32.mrf.mxu2 }
  0xd2   :  { %v198_v29 = vadd.f32 %v745_v0, %v197_v28 }
  0xd3   :  { %v152_v30 = vpop.f32.mrf.mxu0 }
  0xd4   :  { %v253_v31 = vmax.f32 %v198_v29, 0.0  ;;  %v153_v32 = vadd.f32 %v745_v0, %v152_v30 }
  0xd6   :  { %425 = vmatmul.f32.gmra.mxu3 %v253_v31  ;;  %v238_v33 = vmax.f32 %v153_v32, 0.0 }
  0xd8   :  { %380 = vmatmul.f32.gmra.mxu1 %v238_v33  ;;  %v782_v33 = vld [vmem:[%s826_s4] ss:$0 sm:$0xff]  ;;  %s693_s4 = smov [#allocation9]  }
  0xd9   :  { %v200_v34 = vpop.f32.mrf.mxu2  ;;  %s530_s10 = sshll.u32 %s693_s4, 4  ;;  %s531_s10 = int_to_ptr.vmem [resolvable:$true] %s530_s10 }
  0xda   :  { %v201_v35 = vadd.f32 %v745_v0, %v200_v34 }
  0xdb   :  { %v155_v36 = vpop.f32.mrf.mxu0 }
  0xdc   :  { %v254_v37 = vmax.f32 %v201_v35, 0.0  ;;  %v156_v38 = vadd.f32 %v745_v0, %v155_v36 }
  0xde   :  { %428 = vmatmul.f32.gmra.mxu3 %v254_v37  ;;  %v239_v39 = vmax.f32 %v156_v38, 0.0 }
  0xe0   :  { %383 = vmatmul.f32.gmra.mxu1 %v239_v39 }
  0xe1   :  { %v203_v40 = vpop.f32.mrf.mxu2 }
  0xe2   :  { %v204_v41 = vadd.f32 %v745_v0, %v203_v40 }
  0xe3   :  { %v158_v42 = vpop.f32.mrf.mxu0 }
  0xe4   :  { %v255_v43 = vmax.f32 %v204_v41, 0.0  ;;  %v159_v44 = vadd.f32 %v745_v0, %v158_v42 }
  0xe6   :  { %431 = vmatmul.f32.gmra.mxu3 %v255_v43  ;;  %v240_v45 = vmax.f32 %v159_v44, 0.0 }
  0xe8   :  { %386 = vmatmul.f32.gmra.mxu1 %v240_v45 }
  0xe9   :  { %v206_v46 = vpop.f32.mrf.mxu2 }
  0xea   :  { %v207_v47 = vadd.f32 %v745_v0, %v206_v46 }
  0xeb   :  { %v161_v48 = vpop.f32.mrf.mxu0 }
  0xec   :  { %v256_v49 = vmax.f32 %v207_v47, 0.0  ;;  %v162_v50 = vadd.f32 %v745_v0, %v161_v48 }
  0xee   :  { %434 = vmatmul.f32.gmra.mxu3 %v256_v49  ;;  %v241_v51 = vmax.f32 %v162_v50, 0.0 }
  0xf0   :  { %389 = vmatmul.f32.gmra.mxu1 %v241_v51 }
  0xf1   :  { %v209_v52 = vpop.f32.mrf.mxu2 }
  0xf2   :  { %v210_v53 = vadd.f32 %v745_v0, %v209_v52 }
  0xf3   :  { %v164_v54 = vpop.f32.mrf.mxu0 }
  0xf4   :  { %v257_v55 = vmax.f32 %v210_v53, 0.0  ;;  %v165_v56 = vadd.f32 %v745_v0, %v164_v54 }
  0xf6   :  { %437 = vmatmul.f32.gmra.mxu3 %v257_v55  ;;  %v242_v57 = vmax.f32 %v165_v56, 0.0 }
  0xf8   :  { %392 = vmatmul.f32.gmra.mxu1 %v242_v57 }
  0xf9   :  { %v212_v58 = vpop.f32.mrf.mxu2 }
  0xfa   :  { %v213_v59 = vadd.f32 %v745_v0, %v212_v58 }
  0xfb   :  { %v167_v60 = vpop.f32.mrf.mxu0 }
  0xfc   :  { %v258_v61 = vmax.f32 %v213_v59, 0.0  ;;  %v168_v62 = vadd.f32 %v745_v0, %v167_v60 }
  0xfe   :  { %440 = vmatmul.f32.gmra.mxu3 %v258_v61  ;;  %v243_v63 = vmax.f32 %v168_v62, 0.0 }
 0x100   :  { %395 = vmatmul.f32.gmra.mxu1 %v243_v63 }
 0x101   :  { %v215_v1 = vpop.f32.mrf.mxu2 }
 0x102   :  { %v216_v2 = vadd.f32 %v745_v0, %v215_v1 }
 0x103   :  { %v170_v3 = vpop.f32.mrf.mxu0 }
 0x104   :  { %v259_v4 = vmax.f32 %v216_v2, 0.0  ;;  %v171_v5 = vadd.f32 %v745_v0, %v170_v3 }
 0x106   :  { %443 = vmatmul.f32.gmra.mxu3 %v259_v4  ;;  %v244_v6 = vmax.f32 %v171_v5, 0.0 }
 0x108   :  { %398 = vmatmul.f32.gmra.mxu1 %v244_v6 }
 0x109   :  { %v218_v7 = vpop.f32.mrf.mxu2 }
 0x10a   :  { %v219_v8 = vadd.f32 %v745_v0, %v218_v7 }
 0x10b   :  { %v173_v9 = vpop.f32.mrf.mxu0 }
 0x10c   :  { %v260_v10 = vmax.f32 %v219_v8, 0.0  ;;  %v174_v11 = vadd.f32 %v745_v0, %v173_v9 }
 0x10e   :  { %446 = vmatmul.f32.gmra.mxu3 %v260_v10  ;;  %v245_v12 = vmax.f32 %v174_v11, 0.0 }
 0x110   :  { %401 = vmatmul.f32.gmra.mxu1 %v245_v12 }
 0x111   :  { %v221_v13 = vpop.f32.mrf.mxu2 }
 0x112   :  { %v222_v14 = vadd.f32 %v745_v0, %v221_v13 }
 0x113   :  { %v176_v15 = vpop.f32.mrf.mxu0 }
 0x114   :  { %v261_v16 = vmax.f32 %v222_v14, 0.0  ;;  %v177_v17 = vadd.f32 %v745_v0, %v176_v15 }
 0x116   :  { %449 = vmatmul.f32.gmra.mxu3 %v261_v16  ;;  %v246_v18 = vmax.f32 %v177_v17, 0.0 }
 0x118   :  { %404 = vmatmul.f32.gmra.mxu1 %v246_v18 }
 0x119   :  { %v224_v19 = vpop.f32.mrf.mxu2 }
 0x11a   :  { %v225_v20 = vadd.f32 %v745_v0, %v224_v19 }
 0x11b   :  { %v179_v21 = vpop.f32.mrf.mxu0 }
 0x11c   :  { %v262_v22 = vmax.f32 %v225_v20, 0.0  ;;  %v180_v23 = vadd.f32 %v745_v0, %v179_v21 }
 0x11e   :  { %452 = vmatmul.f32.gmra.mxu3 %v262_v22  ;;  %v247_v24 = vmax.f32 %v180_v23, 0.0 }
 0x120   :  { %407 = vmatmul.f32.gmra.mxu1 %v247_v24 }
 0x121   :  { %v227_v25 = vpop.f32.mrf.mxu2 }
 0x122   :  { %v228_v26 = vadd.f32 %v745_v0, %v227_v25 }
 0x123   :  { %v182_v27 = vpop.f32.mrf.mxu0 }
 0x124   :  { %v263_v28 = vmax.f32 %v228_v26, 0.0  ;;  %v183_v29 = vadd.f32 %v745_v0, %v182_v27 }
 0x126   :  { %455 = vmatmul.f32.gmra.mxu3 %v263_v28  ;;  %v248_v30 = vmax.f32 %v183_v29, 0.0 }
 0x128   :  { %410 = vmatmul.f32.gmra.mxu1 %v248_v30 }
 0x129   :  { %v230_v31 = vpop.f32.mrf.mxu2 }
 0x12a   :  { %v231_v32 = vadd.f32 %v745_v0, %v230_v31 }
 0x12c   :  { %v264_v34 = vmax.f32 %v231_v32, 0.0 }
 0x12d   :  { %v366_v35 = vpop.f32.mrf.mxu1 }
 0x12e   :  { %458 = vmatmul.f32.gmra.mxu3 %v264_v34  ;;  %v367_v36 = vadd.f32 %v782_v33, %v366_v35 }
 0x130   :  { %v462_v37 = vmax.f32 %v367_v36, 0.0 }
 0x132   :  { %494 = vst [vmem:[#allocation9] sm:$0xff] %v462_v37 }
 0x135   :  { %v369_v38 = vpop.f32.mrf.mxu1 }
 0x136   :  { %v370_v39 = vadd.f32 %v782_v33, %v369_v38 }
 0x138   :  { %v463_v40 = vmax.f32 %v370_v39, 0.0 }
 0x139   :  { %v414_v41 = vpop.f32.mrf.mxu3 }
 0x13a   :  { %v415_v42 = vadd.f32 %v782_v33, %v414_v41  ;;  %495 = vst [vmem:[#allocation9 + $0x8] sm:$0xff] %v463_v40 }
 0x13c   :  { %v478_v0 = vmax.f32 %v415_v42, 0.0 }
 0x13d   :  { %v372_v43 = vpop.f32.mrf.mxu1 }
 0x13e   :  { %510 = vst [vmem:[#allocation9 + $0x80] sm:$0xff] %v478_v0  ;;  %v373_v44 = vadd.f32 %v782_v33, %v372_v43 }
 0x140   :  { %v464_v45 = vmax.f32 %v373_v44, 0.0 }
 0x141   :  { %v417_v46 = vpop.f32.mrf.mxu3 }
 0x142   :  { %v418_v47 = vadd.f32 %v782_v33, %v417_v46  ;;  %496 = vst [vmem:[#allocation9 + $0x10] sm:$0xff] %v464_v45 }
 0x144   :  { %v479_v48 = vmax.f32 %v418_v47, 0.0 }
 0x145   :  { %v375_v49 = vpop.f32.mrf.mxu1 }
 0x146   :  { %511 = vst [vmem:[#allocation9 + $0x88] sm:$0xff] %v479_v48  ;;  %v376_v50 = vadd.f32 %v782_v33, %v375_v49 }
 0x148   :  { %v465_v51 = vmax.f32 %v376_v50, 0.0 }
 0x149   :  { %v420_v52 = vpop.f32.mrf.mxu3 }
 0x14a   :  { %v421_v53 = vadd.f32 %v782_v33, %v420_v52  ;;  %497 = vst [vmem:[#allocation9 + $0x18] sm:$0xff] %v465_v51 }
 0x14c   :  { %v480_v54 = vmax.f32 %v421_v53, 0.0 }
 0x14d   :  { %v378_v55 = vpop.f32.mrf.mxu1 }
 0x14e   :  { %512 = vst [vmem:[#allocation9 + $0x90] sm:$0xff] %v480_v54  ;;  %v379_v56 = vadd.f32 %v782_v33, %v378_v55 }
 0x150   :  { %v466_v57 = vmax.f32 %v379_v56, 0.0 }
 0x151   :  { %v423_v58 = vpop.f32.mrf.mxu3 }
 0x152   :  { %v424_v59 = vadd.f32 %v782_v33, %v423_v58  ;;  %498 = vst [vmem:[#allocation9 + $0x20] sm:$0xff] %v466_v57 }
 0x154   :  { %v481_v60 = vmax.f32 %v424_v59, 0.0 }
 0x155   :  { %v381_v61 = vpop.f32.mrf.mxu1 }
 0x156   :  { %513 = vst [vmem:[#allocation9 + $0x98] sm:$0xff] %v481_v60  ;;  %v382_v62 = vadd.f32 %v782_v33, %v381_v61 }
 0x158   :  { %v467_v63 = vmax.f32 %v382_v62, 0.0 }
 0x159   :  { %v426_v1 = vpop.f32.mrf.mxu3 }
 0x15a   :  { %v427_v2 = vadd.f32 %v782_v33, %v426_v1  ;;  %499 = vst [vmem:[#allocation9 + $0x28] sm:$0xff] %v467_v63 }
 0x15c   :  { %v482_v3 = vmax.f32 %v427_v2, 0.0 }
 0x15d   :  { %v384_v4 = vpop.f32.mrf.mxu1 }
 0x15e   :  { %514 = vst [vmem:[#allocation9 + $0xa0] sm:$0xff] %v482_v3  ;;  %v385_v5 = vadd.f32 %v782_v33, %v384_v4 }
 0x160   :  { %v468_v6 = vmax.f32 %v385_v5, 0.0 }
 0x161   :  { %v429_v7 = vpop.f32.mrf.mxu3 }
 0x162   :  { %v430_v8 = vadd.f32 %v782_v33, %v429_v7  ;;  %500 = vst [vmem:[#allocation9 + $0x30] sm:$0xff] %v468_v6 }
 0x164   :  { %v483_v9 = vmax.f32 %v430_v8, 0.0 }
 0x165   :  { %v387_v10 = vpop.f32.mrf.mxu1 }
 0x166   :  { %515 = vst [vmem:[#allocation9 + $0xa8] sm:$0xff] %v483_v9  ;;  %v388_v11 = vadd.f32 %v782_v33, %v387_v10 }
 0x168   :  { %v469_v12 = vmax.f32 %v388_v11, 0.0 }
 0x169   :  { %v432_v13 = vpop.f32.mrf.mxu3 }
 0x16a   :  { %v433_v14 = vadd.f32 %v782_v33, %v432_v13  ;;  %501 = vst [vmem:[#allocation9 + $0x38] sm:$0xff] %v469_v12 }
 0x16c   :  { %v484_v15 = vmax.f32 %v433_v14, 0.0 }
 0x16d   :  { %v390_v16 = vpop.f32.mrf.mxu1 }
 0x16e   :  { %516 = vst [vmem:[#allocation9 + $0xb0] sm:$0xff] %v484_v15  ;;  %v391_v17 = vadd.f32 %v782_v33, %v390_v16 }
 0x170   :  { %v470_v18 = vmax.f32 %v391_v17, 0.0 }
 0x171   :  { %v435_v19 = vpop.f32.mrf.mxu3 }
 0x172   :  { %v436_v20 = vadd.f32 %v782_v33, %v435_v19  ;;  %502 = vst [vmem:[#allocation9 + $0x40] sm:$0xff] %v470_v18 }
 0x174   :  { %v485_v21 = vmax.f32 %v436_v20, 0.0 }
 0x175   :  { %v393_v22 = vpop.f32.mrf.mxu1 }
 0x176   :  { %517 = vst [vmem:[#allocation9 + $0xb8] sm:$0xff] %v485_v21  ;;  %v394_v23 = vadd.f32 %v782_v33, %v393_v22 }
 0x178   :  { %v471_v24 = vmax.f32 %v394_v23, 0.0 }
 0x179   :  { %v438_v25 = vpop.f32.mrf.mxu3 }
 0x17a   :  { %v439_v26 = vadd.f32 %v782_v33, %v438_v25  ;;  %503 = vst [vmem:[#allocation9 + $0x48] sm:$0xff] %v471_v24 }
 0x17c   :  { %v486_v27 = vmax.f32 %v439_v26, 0.0 }
 0x17d   :  { %v396_v28 = vpop.f32.mrf.mxu1 }
 0x17e   :  { %518 = vst [vmem:[#allocation9 + $0xc0] sm:$0xff] %v486_v27  ;;  %v397_v29 = vadd.f32 %v782_v33, %v396_v28 }
 0x180   :  { %v472_v30 = vmax.f32 %v397_v29, 0.0 }
 0x181   :  { %v441_v31 = vpop.f32.mrf.mxu3 }
 0x182   :  { %v442_v32 = vadd.f32 %v782_v33, %v441_v31  ;;  %504 = vst [vmem:[#allocation9 + $0x50] sm:$0xff] %v472_v30 }
 0x184   :  { %v487_v34 = vmax.f32 %v442_v32, 0.0 }
 0x185   :  { %v399_v35 = vpop.f32.mrf.mxu1 }
 0x186   :  { %519 = vst [vmem:[#allocation9 + $0xc8] sm:$0xff] %v487_v34  ;;  %v400_v36 = vadd.f32 %v782_v33, %v399_v35 }
 0x188   :  { %v473_v37 = vmax.f32 %v400_v36, 0.0 }
 0x189   :  { %v444_v38 = vpop.f32.mrf.mxu3 }
 0x18a   :  { %v445_v39 = vadd.f32 %v782_v33, %v444_v38  ;;  %505 = vst [vmem:[#allocation9 + $0x58] sm:$0xff] %v473_v37 }
 0x18c   :  { %v488_v40 = vmax.f32 %v445_v39, 0.0 }
 0x18d   :  { %v402_v41 = vpop.f32.mrf.mxu1 }
 0x18e   :  { %520 = vst [vmem:[#allocation9 + $0xd0] sm:$0xff] %v488_v40  ;;  %v403_v42 = vadd.f32 %v782_v33, %v402_v41 }
 0x190   :  { %v474_v0 = vmax.f32 %v403_v42, 0.0 }
 0x191   :  { %v447_v43 = vpop.f32.mrf.mxu3 }
 0x192   :  { %v448_v44 = vadd.f32 %v782_v33, %v447_v43  ;;  %506 = vst [vmem:[#allocation9 + $0x60] sm:$0xff] %v474_v0 }
 0x194   :  { %v489_v45 = vmax.f32 %v448_v44, 0.0 }
 0x195   :  { %v405_v46 = vpop.f32.mrf.mxu1 }
 0x196   :  { %521 = vst [vmem:[#allocation9 + $0xd8] sm:$0xff] %v489_v45  ;;  %v406_v47 = vadd.f32 %v782_v33, %v405_v46 }
 0x198   :  { %v475_v48 = vmax.f32 %v406_v47, 0.0 }
 0x199   :  { %v450_v49 = vpop.f32.mrf.mxu3 }
 0x19a   :  { %v451_v50 = vadd.f32 %v782_v33, %v450_v49  ;;  %507 = vst [vmem:[#allocation9 + $0x68] sm:$0xff] %v475_v48 }
 0x19c   :  { %v490_v51 = vmax.f32 %v451_v50, 0.0 }
 0x19d   :  { %v408_v52 = vpop.f32.mrf.mxu1 }
 0x19e   :  { %522 = vst [vmem:[#allocation9 + $0xe0] sm:$0xff] %v490_v51  ;;  %v409_v53 = vadd.f32 %v782_v33, %v408_v52 }
 0x1a0   :  { %v476_v54 = vmax.f32 %v409_v53, 0.0 }
 0x1a1   :  { %v453_v55 = vpop.f32.mrf.mxu3 }
 0x1a2   :  { %v454_v56 = vadd.f32 %v782_v33, %v453_v55  ;;  %508 = vst [vmem:[#allocation9 + $0x70] sm:$0xff] %v476_v54 }
 0x1a4   :  { %v491_v57 = vmax.f32 %v454_v56, 0.0 }
 0x1a5   :  { %v411_v58 = vpop.f32.mrf.mxu1 }
 0x1a6   :  { %523 = vst [vmem:[#allocation9 + $0xe8] sm:$0xff] %v491_v57  ;;  %v412_v59 = vadd.f32 %v782_v33, %v411_v58 }
 0x1a8   :  { %v477_v60 = vmax.f32 %v412_v59, 0.0 }
 0x1a9   :  { %v456_v61 = vpop.f32.mrf.mxu3 }
 0x1aa   :  { %v457_v62 = vadd.f32 %v782_v33, %v456_v61  ;;  %509 = vst [vmem:[#allocation9 + $0x78] sm:$0xff] %v477_v60 }
 0x1ac   :  { %v492_v63 = vmax.f32 %v457_v62, 0.0 }
 0x1ae   :  { %524 = vst [vmem:[#allocation9 + $0xf0] sm:$0xff] %v492_v63 }
 0x1b1   :  { %v459_v1 = vpop.f32.mrf.mxu3 }
 0x1b2   :  { %v460_v2 = vadd.f32 %v782_v33, %v459_v1 }
 0x1b4   :  { %v493_v3 = vmax.f32 %v460_v2, 0.0 }
 0x1b6   :  { %525 = vst [vmem:[#allocation9 + $0xf8] sm:$0xff] %v493_v3 }
 0x1b7   :  { %538 = dma.vmem_to_hbm [thread:$0]  %s531_s10, 4096, %s533_s13, [#allocation5], %s689_s26, %s689_s26, %s690_s27  }
 0x1b8   :  { %686 = dma.done.wait [#allocation5], 4096  }
 0x1b9   :  { %687 = vsyncadd [#allocation5], 4294963200 }
 0x1ba   :  { %543 = vsyncpa [#allocation4], 1 }
 0x1bb   :  { %544 = vsyncpa [#allocation7], 1 }
 0x1bc   :  { %545 = vsyncpa [#allocation5], 1 }

</bundles_post_ra>
